<compile_context>
chip_gen: v7x
topology: tpu7x:2x2x1
jax: 0.10.0
libtpu: 0.0.40
codegen_flags: <defaults>
</compile_context>

<pallas_src>
import numpy as np
import jax
import jax.numpy as jnp
from jax.experimental import pallas as pl
from jax.experimental.pallas import tpu as pltpu


def _make_divisible(v, divisor, min_value=None):
    if min_value is None:
        min_value = divisor
    new_v = max(min_value, int(v + divisor / 2) // divisor * divisor)
    if new_v < 0.9 * v:
        new_v += divisor
    return new_v


def _round_up(v, m):
    return -(-v // m) * m


def _stable_sigmoid(x):
    # Exact, overflow-safe sigmoid.  exp() runs on the EUP slot; the divide is cheap
    # and exact (review asked for parity with torch.sigmoid, not the approx recip).
    z = jnp.exp(-jnp.abs(x))
    p = z / (1.0 + z)
    return jnp.where(x >= 0.0, 1.0 - p, p)


# ---------------------------------------------------------------------------
# Fused SE kernel factory.  One grid step == TB batch samples.
#   x_ref : (TB, C, HWp)  activations, spatial on the lane axis (HWp % 128 == 0)
#   wp_ref: (rows, W)     packed params: [w1t | b1 | w2t | b2] in 8-aligned row blocks
#   o_ref : (TB, C, HWp)
# ---------------------------------------------------------------------------
def _make_se_kernel(C, S, off_b1, off_w2t, off_b2, inv_hw):
    def kernel(x_ref, wp_ref, o_ref):
        # --- squeeze: global average pool over the lane-dense spatial axis -------
        xs = x_ref[...].astype(jnp.float32)                       # (TB, C, HWp)
        pooled = jnp.sum(xs, axis=2) * inv_hw                     # (TB, C); /true HW
                                                                  # so zero-pad is harmless
        # --- excitation: two tiny FCs, kept on VPU/XLU (MXU wasted on 8-wide K) --
        w1t = wp_ref[0:C, 0:S]                                    # (C, S) = fc1.weight.T
        b1 = wp_ref[off_b1:off_b1 + 1, 0:S]                       # (1, S)
        w2t = wp_ref[off_w2t:off_w2t + S, 0:C]                    # (S, C) = fc2.weight.T
        b2 = wp_ref[off_b2:off_b2 + 1, 0:C]                       # (1, C)

        z = jnp.sum(pooled[:, :, None] * w1t[None, :, :], axis=1) + b1   # (TB, S)
        z = z * _stable_sigmoid(z)                                        # SiLU
        y = _stable_sigmoid(
            jnp.sum(z[:, :, None] * w2t[None, :, :], axis=1) + b2)        # (TB, C)

        # --- gate: re-read the tile from VMEM (don't hold it in vregs across FCs)
        o_ref[...] = (x_ref[...].astype(jnp.float32) * y[:, :, None]).astype(o_ref.dtype)

    return kernel


def _choose_block_batch(n, c, hw_pad, itemsize):
    # ~1 MiB activation tile: big enough to amortize per-step overhead, small enough
    # that in+out double-buffering (~4x tile) fits every chip's default scoped VMEM.
    target_bytes = 1 << 20
    tb = max(1, target_bytes // max(1, c * hw_pad * itemsize))
    tb = min(tb, n)
    if n > 1:
        tb = min(tb, pl.cdiv(n, 2))   # keep >= 2 grid steps -> v7x uses both TensorCores
    return tb


# ---------------------------------------------------------------------------
# Wrapper
# ---------------------------------------------------------------------------
def se_forward(x_nchw, params, alias_input=False):
    N, C, H, W = x_nchw.shape
    HW = H * W
    HW_pad = _round_up(HW, 128)            # lane-dense stores (no masked vst.msk)
    dtype = x_nchw.dtype                   # pass-through dtype: no wrapper-side HBM copy
    itemsize = jnp.dtype(dtype).itemsize

    x = x_nchw.reshape(N, C, HW)           # reshape only (free)
    if HW_pad != HW:
        x = jnp.pad(x, ((0, 0), (0, 0), (0, HW_pad - HW)))

    # torch-layout params: fc1_w (S, C), fc1_b (S,), fc2_w (C, S), fc2_b (C,)
    fc1_w = params["fc1_w"].astype(jnp.float32)
    fc1_b = params["fc1_b"].astype(jnp.float32)
    fc2_w = params["fc2_w"].astype(jnp.float32)
    fc2_b = params["fc2_b"].astype(jnp.float32)
    S = fc1_w.shape[0]
    assert fc1_w.shape == (S, C) and fc2_w.shape == (C, S)

    # Pack all 4 tiny params into ONE array (sublane-aligned sections) -> 1 VMEM
    # buffer / 1 DMA instead of 4 double-buffered padded tiles.
    RC, RS = _round_up(C, 8), _round_up(S, 8)
    off_b1, off_w2t, off_b2 = RC, RC + 8, RC + 8 + RS
    rows, width = RC + 8 + RS + 8, max(C, S)
    wpack = jnp.zeros((rows, width), jnp.float32)
    wpack = wpack.at[0:C, 0:S].set(fc1_w.T)          # w1t
    wpack = wpack.at[off_b1, 0:S].set(fc1_b)         # b1
    wpack = wpack.at[off_w2t:off_w2t + S, 0:C].set(fc2_w.T)   # w2t
    wpack = wpack.at[off_b2, 0:C].set(fc2_b)         # b2

    TB = _choose_block_batch(N, C, HW_pad, itemsize)
    grid = (pl.cdiv(N, TB),)

    kernel = _make_se_kernel(C, S, off_b1, off_w2t, off_b2, 1.0 / float(HW))

    act_bytes = N * C * HW_pad * itemsize
    cost = pl.CostEstimate(
        flops=2 * N * C * HW + 4 * N * C * S,
        transcendentals=N * (S + C),
        bytes_accessed=2 * act_bytes + int(wpack.size) * 4,
    )

    out = pl.pallas_call(
        kernel,
        out_shape=jax.ShapeDtypeStruct((N, C, HW_pad), dtype),
        grid=grid,
        in_specs=[
            pl.BlockSpec((TB, C, HW_pad), lambda b: (b, 0, 0)),
            pl.BlockSpec((rows, width), lambda b: (0, 0)),
        ],
        out_specs=pl.BlockSpec((TB, C, HW_pad), lambda b: (b, 0, 0)),
        compiler_params=pltpu.CompilerParams(
            dimension_semantics=("parallel",)),
        cost_estimate=cost,
        # Only safe if the caller doesn't reuse x after the SE gate.
        input_output_aliases=({0: 0} if alias_input else {}),
    )(x, wpack)

    if HW_pad != HW:
        out = out[:, :, :HW]
    return out.reshape(N, C, H, W)


# ---------------------------------------------------------------------------
# Pure-JAX reference (torch SELayer semantics) for verification
# ---------------------------------------------------------------------------
def se_reference(x_nchw, params):
    x = x_nchw.astype(jnp.float32)
    pooled = x.mean(axis=(2, 3))                                   # (N, C)
    z = pooled @ params["fc1_w"].T + params["fc1_b"]               # (N, S)
    z = z * jax.nn.sigmoid(z)                                      # SiLU
    y = jax.nn.sigmoid(z @ params["fc2_w"].T + params["fc2_b"])    # (N, C)
    return x * y[:, :, None, None]


if __name__ == "__main__":
    # SELayer(inp=8, oup=8, reduction=4) -> squeeze = _make_divisible(8 // 4, 8) = 8
    inp = oup = 8
    N, H, W = 2, 16, 16
    C = oup
    S = _make_divisible(inp // 4, 8)

    key = jax.random.PRNGKey(0)
    kx, k1, k2, k3, k4 = jax.random.split(key, 5)
    x = jax.random.normal(kx, (N, C, H, W), dtype=jnp.float32)
    params = dict(
        fc1_w=(0.3 * jax.random.normal(k1, (S, C))).astype(jnp.float32),  # torch fc1.weight
        fc1_b=(0.1 * jax.random.normal(k2, (S,))).astype(jnp.float32),
        fc2_w=(0.3 * jax.random.normal(k3, (C, S))).astype(jnp.float32),  # torch fc2.weight
        fc2_b=(0.1 * jax.random.normal(k4, (C,))).astype(jnp.float32),
    )

    fwd = jax.jit(se_forward)

    # f32 I/O path (matches torch defaults); exact-sigmoid kernel -> tight tolerance.
    out = jax.block_until_ready(fwd(x, params))
    ref = se_reference(x, params)
    assert out.shape == x.shape and out.dtype == x.dtype
    if not np.allclose(np.asarray(out), np.asarray(ref), atol=1e-4, rtol=1e-4):
        raise SystemExit("kernel output mismatch vs reference (f32)")

    # bf16 HBM I/O path (compute stays f32 in-kernel) — half the HBM traffic.
    x_bf = x.astype(jnp.bfloat16)
    out_bf = jax.block_until_ready(fwd(x_bf, params))
    ref_bf = se_reference(x_bf.astype(jnp.float32), params)
    assert out_bf.shape == x.shape and out_bf.dtype == jnp.bfloat16
    if not np.allclose(np.asarray(out_bf, dtype=np.float32), np.asarray(ref_bf),
                       atol=3e-2, rtol=3e-2):
        raise SystemExit("kernel output mismatch vs reference (bf16 I/O)")

    print("KERNEL_OK")
</pallas_src>

<mosaic_0001>
module attributes {stable_mosaic.version = 11 : i64} {
  func.func @kernel(%arg0: i32, %arg1: memref<1x8x256xf32, #tpu.memory_space<vmem>>, %arg2: memref<32x8xf32, #tpu.memory_space<vmem>>, %arg3: memref<1x8x256xf32, #tpu.memory_space<vmem>>) attributes {dimension_semantics = [#tpu.dimension_semantics<parallel>], iteration_bounds = array<i64: 2>, scalar_prefetch = 0 : i64, scratch_operands = 0 : i64, tpu.core_type = #tpu.core_type<tc>, window_params = [{transform_indices = @transform_0, window_bounds = array<i64: 1, 8, 256>}, {pipeline_mode = #tpu.pipeline_mode<synchronous>, transform_indices = @transform_1, window_bounds = array<i64: 32, 8>}, {transform_indices = @transform_2, window_bounds = array<i64: 1, 8, 256>}]} {
    %c0 = arith.constant 0 : index
    %c0_0 = arith.constant 0 : index
    %c0_1 = arith.constant 0 : index
    %0 = vector.load %arg1[%c0, %c0_0, %c0_1] : memref<1x8x256xf32, #tpu.memory_space<vmem>>, vector<1x8x256xf32>
    %cst = arith.constant dense<0.000000e+00> : vector<1x8xf32>
    %1 = vector.multi_reduction <add>, %0, %cst [2] : vector<1x8x256xf32> to vector<1x8xf32>
    %cst_2 = arith.constant 3.906250e-03 : f32
    %2 = vector.broadcast %cst_2 : f32 to vector<1x8xf32>
    %3 = arith.mulf %1, %2 : vector<1x8xf32>
    %c0_3 = arith.constant 0 : index
    %c0_4 = arith.constant 0 : index
    %4 = vector.load %arg2[%c0_3, %c0_4] : memref<32x8xf32, #tpu.memory_space<vmem>>, vector<8x8xf32>
    %c8 = arith.constant 8 : index
    %c0_5 = arith.constant 0 : index
    %5 = vector.load %arg2[%c8, %c0_5] : memref<32x8xf32, #tpu.memory_space<vmem>>, vector<1x8xf32>
    %c16 = arith.constant 16 : index
    %c0_6 = arith.constant 0 : index
    %6 = vector.load %arg2[%c16, %c0_6] : memref<32x8xf32, #tpu.memory_space<vmem>>, vector<8x8xf32>
    %c24 = arith.constant 24 : index
    %c0_7 = arith.constant 0 : index
    %7 = vector.load %arg2[%c24, %c0_7] : memref<32x8xf32, #tpu.memory_space<vmem>>, vector<1x8xf32>
    %8 = vector.shape_cast %3 : vector<1x8xf32> to vector<1x8x1xf32>
    %9 = vector.shape_cast %4 : vector<8x8xf32> to vector<1x8x8xf32>
    %10 = vector.broadcast %8 : vector<1x8x1xf32> to vector<1x8x8xf32>
    %11 = arith.mulf %10, %9 : vector<1x8x8xf32>
    %cst_8 = arith.constant dense<0.000000e+00> : vector<1x8xf32>
    %12 = vector.multi_reduction <add>, %11, %cst_8 [1] : vector<1x8x8xf32> to vector<1x8xf32>
    %13 = arith.addf %12, %5 : vector<1x8xf32>
    %14 = math.absf %13 : vector<1x8xf32>
    %cst_9 = arith.constant 0.000000e+00 : f32
    %15 = vector.broadcast %cst_9 : f32 to vector<1x8xf32>
    %16 = arith.subf %15, %14 : vector<1x8xf32>
    %17 = math.exp %16 : vector<1x8xf32>
    %cst_10 = arith.constant 1.000000e+00 : f32
    %18 = vector.broadcast %cst_10 : f32 to vector<1x8xf32>
    %19 = arith.addf %18, %17 : vector<1x8xf32>
    %20 = arith.divf %17, %19 : vector<1x8xf32>
    %cst_11 = arith.constant 0.000000e+00 : f32
    %21 = vector.broadcast %cst_11 : f32 to vector<1x8xf32>
    %22 = arith.cmpf oge, %13, %21 : vector<1x8xf32>
    %cst_12 = arith.constant 1.000000e+00 : f32
    %23 = vector.broadcast %cst_12 : f32 to vector<1x8xf32>
    %24 = arith.subf %23, %20 : vector<1x8xf32>
    %25 = arith.select %22, %24, %20 : vector<1x8xi1>, vector<1x8xf32>
    %26 = arith.mulf %13, %25 : vector<1x8xf32>
    %27 = vector.shape_cast %26 : vector<1x8xf32> to vector<1x8x1xf32>
    %28 = vector.shape_cast %6 : vector<8x8xf32> to vector<1x8x8xf32>
    %29 = vector.broadcast %27 : vector<1x8x1xf32> to vector<1x8x8xf32>
    %30 = arith.mulf %29, %28 : vector<1x8x8xf32>
    %cst_13 = arith.constant dense<0.000000e+00> : vector<1x8xf32>
    %31 = vector.multi_reduction <add>, %30, %cst_13 [1] : vector<1x8x8xf32> to vector<1x8xf32>
    %32 = arith.addf %31, %7 : vector<1x8xf32>
    %33 = math.absf %32 : vector<1x8xf32>
    %cst_14 = arith.constant 0.000000e+00 : f32
    %34 = vector.broadcast %cst_14 : f32 to vector<1x8xf32>
    %35 = arith.subf %34, %33 : vector<1x8xf32>
    %36 = math.exp %35 : vector<1x8xf32>
    %cst_15 = arith.constant 1.000000e+00 : f32
    %37 = vector.broadcast %cst_15 : f32 to vector<1x8xf32>
    %38 = arith.addf %37, %36 : vector<1x8xf32>
    %39 = arith.divf %36, %38 : vector<1x8xf32>
    %cst_16 = arith.constant 0.000000e+00 : f32
    %40 = vector.broadcast %cst_16 : f32 to vector<1x8xf32>
    %41 = arith.cmpf oge, %32, %40 : vector<1x8xf32>
    %cst_17 = arith.constant 1.000000e+00 : f32
    %42 = vector.broadcast %cst_17 : f32 to vector<1x8xf32>
    %43 = arith.subf %42, %39 : vector<1x8xf32>
    %44 = arith.select %41, %43, %39 : vector<1x8xi1>, vector<1x8xf32>
    %c0_18 = arith.constant 0 : index
    %c0_19 = arith.constant 0 : index
    %c0_20 = arith.constant 0 : index
    %45 = vector.load %arg1[%c0_18, %c0_19, %c0_20] : memref<1x8x256xf32, #tpu.memory_space<vmem>>, vector<1x8x256xf32>
    %46 = vector.shape_cast %44 : vector<1x8xf32> to vector<1x8x1xf32>
    %47 = vector.broadcast %46 : vector<1x8x1xf32> to vector<1x8x256xf32>
    %48 = arith.mulf %45, %47 : vector<1x8x256xf32>
    %c0_21 = arith.constant 0 : index
    %c0_22 = arith.constant 0 : index
    %c0_23 = arith.constant 0 : index
    %49 = vector.load %arg3[%c0_21, %c0_22, %c0_23] : memref<1x8x256xf32, #tpu.memory_space<vmem>>, vector<1x8x256xf32>
    tpu.vector_store %arg3[%c0_21, %c0_22, %c0_23], %48 {strides = array<i32>} : memref<1x8x256xf32, #tpu.memory_space<vmem>>, vector<1x8x256xf32>,
    return
  }
  func.func @transform_0(%arg0: i32) -> (i32, i32, i32) {
    %c0_i32 = arith.constant 0 : i32
    %c0_i32_0 = arith.constant 0 : i32
    %c0_i32_1 = arith.constant 0 : i32
    return %arg0, %c0_i32, %c0_i32_0 : i32, i32, i32
  }
  func.func @transform_1(%arg0: i32) -> (i32, i32) {
    %c0_i32 = arith.constant 0 : i32
    %c0_i32_0 = arith.constant 0 : i32
    %c0_i32_1 = arith.constant 0 : i32
    return %c0_i32, %c0_i32_0 : i32, i32
  }
  func.func @transform_2(%arg0: i32) -> (i32, i32, i32) {
    %c0_i32 = arith.constant 0 : i32
    %c0_i32_0 = arith.constant 0 : i32
    %c0_i32_1 = arith.constant 0 : i32
    return %arg0, %c0_i32, %c0_i32_0 : i32, i32, i32
  }
}

</mosaic_0001>

<bundles_post_ra>
// kernel: se_forward.1
= control target key start
LH: loop header
LB: loop body
LE: loop exit
PB: predicated region body
PF: predicated region fallthrough
CT: control target
= control target key end

     0   :  { %s319_s9 = smov 0   ;;  %s365_s0 = inlined_call_operand.vmem [shape: f32[2,8,256], index: 0, kind: input, shape index: {}]   ;;  %s366_s1 = inlined_call_operand.vmem [shape: f32[32,8], index: 1, kind: input, shape index: {}]   ;;  %s367_s2 = inlined_call_operand.vmem [shape: f32[2,8,256], index: 2, kind: output, shape index: {}]  }
   0x1 LB: > { %s267_s10 = sadd.s32 4294967295, %s302_s9   ;;  %p271_p0 = scmp.ge.s32.totalorder %s302_s9, 1  ;;  %s302_s9 = sphi %s319_s9, %s12_s9  }
   0x2   : > { %p112_p1 = scmp.lt.s32.totalorder %s302_s9, 3 }
   0x4   : > { %p113_p2 = pnand %p271_p0, %p112_p1 }
   0x5   : > { %p134_p3 = scmp.lt.s32.totalorder (!%p113_p2), %s267_s10, 1  ;;  %v150_v3 = vld [vmem:[%s366_s1] sm:$0xff] (!%p113_p2)  ;;  %vm155_vm0 = vcmask (!%p113_p2), 64512   ;;  %v151_v13 = vld [vmem:[%s366_s1 + $0x8] sm:$0x1] (!%p113_p2)  ;;  %v175_v21 = vlaneseq (!%p113_p2)  ;;  %v152_v30 = vld [vmem:[%s366_s1 + $0x10] sm:$0xff] (!%p113_p2) }
   0x6   : > { %116 = sbr.rel (%p113_p2) target bundleno = 506 (0x1fa), region = 28  ;;  %v153_v39 = vld [vmem:[%s366_s1 + $0x18] sm:$0x1] (!%p113_p2) }
   0x7   : > { %v176_v23 = vshrl.u32 (!%p113_p2), %v175_v21, 7 }
   0x9   : > { %v177_v26 = vsub.s32 (!%p113_p2), 0, %v176_v23 }
   0xd   : > { %s369_s10 = smov (!%p134_p3, %s267_s10), 1 }
   0xe   : > { %s278_s11 = sshll.u32 %s369_s10, 4 }
   0xf   : > { %s138_s14 = scalar_lea.vmem %s365_s0, %s278_s11  ;;  %s143_s25 = scalar_lea.vmem %s367_s2, %s278_s11 }
  0x10   : > { %v335_v0 = vld [vmem:[%s138_s14] sm:$0xff]  ;;  %v337_v1 = vld [vmem:[%s138_s14 + $0x8] sm:$0xff] }
  0x11   : > { %v146_v2 = vadd.f32 %v337_v1, %v335_v0 }
  0x13   : > { %147 = vadd.xlane.f32.xlu0 %v146_v2 }
  0xa0   : > { %v148_v4 = vpop.xlane.xlu0 %147 }
  0xa1   : > { %v149_v5 = vmul.f32 0.00390625, %v148_v4 }
  0xa3   : > { %v154_v6 = vmul.f32 %v150_v3, %v149_v5 }
  0xa5   : > { %v156_v7 = vsel %vm155_vm0, %v154_v6, 0.0 }
  0xa6   : > { %v157_v8 = vrot.slane %v156_v7, 4 }
  0xa8   : > { %v158_v9 = vadd.f32 %v157_v8, %v156_v7 }
  0xaa   : > { %v159_v10 = vrot.slane %v158_v9, 2 }
  0xac   : > { %v160_v11 = vadd.f32 %v159_v10, %v158_v9 }
  0xae   : > { %v161_v12 = vrot.slane %v160_v11, 1 }
  0xb0   : > { %v162_v14 = vadd.f32 %v161_v12, %v160_v11 }
  0xb2   : > { %v163_v15 = vadd.f32 %v162_v14, %v151_v13 }
  0xb4   : > { %v164_v16 = vand.u32 2147483647, %v163_v15  ;;  %vm171_vm1 = vcmp.ge.f32.partialorder %v163_v15, 0.0 }
  0xb6   : > { %v165_v17 = vsub.f32 0.0, %v164_v16 }
  0xb8   : > { %v166_v18 = vmul.f32 1.442695, %v165_v17 }
  0xba   : > { %288 = vpow2.f32 %v166_v18 }
  0xc4   : > { %v289_v19 = vpop.eup %288 }
  0xc5   : > { %v168_v20 = vadd.f32 1.0, %v289_v19 }
  0xc7   : > { %290 = vrcp.f32 %v168_v20 }
  0xd1   : > { %v291_v22 = vpop.eup %290 }
  0xd2   : > { %v170_v24 = vmul.f32 %v291_v22, %v289_v19 }
  0xd4   : > { %v172_v25 = vsub.f32 1.0, %v170_v24 }
  0xd6   : > { %v173_v27 = vsel %vm171_vm1, %v172_v25, %v170_v24 }
  0xd7   : > { %v174_v28 = vmul.f32 %v173_v27, %v163_v15 }
  0xd9   : > { %v178_v29 = vrot.slane %v174_v28, %v177_v26 }
  0xdb   : > { %180 = vbcast.lane.b32.xlu0 %v178_v29, 256 }
 0x14d   : > { %v181_v31 = vpop.permute.xlu0 %180 }
 0x14e   : > { %v182_v32 = vmul.f32 %v181_v31, %v152_v30 }
 0x150   : > { %v183_v33 = vsel %vm155_vm0, %v182_v32, 0.0 }
 0x151   : > { %v184_v34 = vrot.slane %v183_v33, 4 }
 0x153   : > { %v185_v35 = vadd.f32 %v184_v34, %v183_v33 }
 0x155   : > { %v186_v36 = vrot.slane %v185_v35, 2 }
 0x157   : > { %v187_v37 = vadd.f32 %v186_v36, %v185_v35 }
 0x159   : > { %v188_v38 = vrot.slane %v187_v37, 1 }
 0x15b   : > { %v189_v40 = vadd.f32 %v188_v38, %v187_v37 }
 0x15d   : > { %v190_v41 = vadd.f32 %v189_v40, %v153_v39 }
 0x15f   : > { %v191_v42 = vand.u32 2147483647, %v190_v41  ;;  %vm198_vm2 = vcmp.ge.f32.partialorder %v190_v41, 0.0 }
 0x161   : > { %v192_v43 = vsub.f32 0.0, %v191_v42 }
 0x163   : > { %v193_v44 = vmul.f32 1.442695, %v192_v43 }
 0x165   : > { %292 = vpow2.f32 %v193_v44 }
 0x16f   : > { %v293_v45 = vpop.eup %292 }
 0x170   : > { %v195_v46 = vadd.f32 1.0, %v293_v45 }
 0x172   : > { %294 = vrcp.f32 %v195_v46 }
 0x17c   : > { %v295_v47 = vpop.eup %294 }
 0x17d   : > { %v197_v48 = vmul.f32 %v295_v47, %v293_v45 }
 0x17f   : > { %v199_v49 = vsub.f32 1.0, %v197_v48 }
 0x181   : > { %v200_v50 = vsel %vm198_vm2, %v199_v49, %v197_v48 }
 0x182   : > { %v204_v51 = vrot.slane %v200_v50, %v177_v26 }
 0x184   : > { %206 = vbcast.lane.b32.xlu1 %v204_v51, 256 }
 0x1f6   : > { %v207_v52 = vpop.permute.xlu1 %206 }
 0x1f7   : > { %v208_v53 = vmul.f32 %v207_v52, %v335_v0  ;;  %v209_v54 = vmul.f32 %v207_v52, %v337_v1 }
 0x1f9   : > { %210 = vst [vmem:[%s143_s25] sm:$0xff] %v208_v53  ;;  %211 = vst [vmem:[%s143_s25 + $0x8] sm:$0xff] %v209_v54 }
 0x1fa PF: > { %s12_s9 = sadd.s32 1, %s302_s9  }
 0x1fb   : > { %p9_p4 = scmp.ge.s32.totalorder %s12_s9, 4  }
 0x1fd   :  { %11 = sbr.rel (!%p9_p4) target bundleno = 1 (0x1), region = 58 }

</bundles_post_ra>
